<compile_context>
chip_gen: v7x
topology: tpu7x:2x2x1
jax: 0.10.0
libtpu: 0.0.40
codegen_flags: <defaults>
</compile_context>

<pallas_src>
import functools

import jax
import jax.numpy as jnp
import numpy as np
from jax.experimental import pallas as pl
from jax.experimental.pallas import tpu as pltpu

K = 3  # Conv1d kernel size (kernel_size=3, padding=1 in the module)


def _mish(v, approx):
    # Mish(x) = x * tanh(softplus(x)).  With t = e^x and s = (1 + t)^2:
    #   tanh(log(1 + t)) = (s - 1) / (s + 1)
    if approx:
        t = jnp.exp(jnp.minimum(v, 20.0))   # clamp: tanh(softplus(v)) -> 1 anyway
        s = (1.0 + t) * (1.0 + t)
        return v * (s - 1.0) * pl.reciprocal(s + 1.0, approx=True)
    return v * jnp.tanh(jnp.logaddexp(v, 0.0))


def _group_norm(y, gmat, gmat_t, gamma, beta, n_per_group, eps=1e-5):
    # y: (Bb, T, C) f32.  Per-(batch, group) statistics via tiny one-hot matmuls.
    s = jnp.sum(y, axis=1)                                          # (Bb, C)
    sq = jnp.sum(y * y, axis=1)                                     # (Bb, C)
    sg = jnp.dot(s, gmat, preferred_element_type=jnp.float32)       # (Bb, G)
    sqg = jnp.dot(sq, gmat, preferred_element_type=jnp.float32)     # (Bb, G)
    mean_g = sg / n_per_group
    # clamp: single-pass E[x^2] - E[x]^2 can cancel to a tiny negative value
    var_g = jnp.maximum(sqg / n_per_group - mean_g * mean_g, 0.0)
    mean_c = jnp.dot(mean_g, gmat_t, preferred_element_type=jnp.float32)[:, None, :]
    var_c = jnp.dot(var_g, gmat_t, preferred_element_type=jnp.float32)[:, None, :]
    return (y - mean_c) * jax.lax.rsqrt(var_c + eps) * gamma + beta


def crb_kernel(x_ref, sb_ref, w1_ref, w2_ref, rows_ref, gmat_ref, gmatt_ref,
               edge_ref, *rest, approx, project_res):
    if project_res:
        wr_ref, out_ref = rest
    else:
        (out_ref,) = rest

    Bb, T, C = out_ref.shape
    Cin = x_ref.shape[-1]
    G = gmat_ref.shape[-1]
    N = Bb * T
    n_per_group = float(T * (C // G))
    cdtype = w1_ref.dtype            # bf16 (fast path) or f32 (precise path)

    gmat = gmat_ref[...]
    gmat_t = gmatt_ref[...]

    # Packed per-channel rows: b1, g1, be1, b2, g2, be2, br, <pad>  (8, C) f32
    rows = rows_ref[...]
    b1, g1, be1 = rows[0:1], rows[1:2], rows[2:3]
    b2, g2, be2 = rows[3:4], rows[4:5], rows[5:6]
    br = rows[6:7]

    # Conv zero-padding masks for the rolled +/-1 time taps (f32, (N, 1) each).
    em = edge_ref[...]                                              # (N, 2)
    not_first, not_last = em[:, 0:1], em[:, 1:2]

    # ---- block 0: Conv1d(Cin->Cout, k=3, p=1) from rolled taps (XLU) + 3 dots.
    xc = x_ref[...].reshape(N, Cin)                                 # cdtype
    x32 = xc.astype(jnp.float32)                                    # rolls in f32
    x_prev = (pltpu.roll(x32, shift=1, axis=0) * not_first).astype(cdtype)
    x_next = (pltpu.roll(x32, shift=N - 1, axis=0) * not_last).astype(cdtype)

    acc = (jnp.dot(x_prev, w1_ref[0], preferred_element_type=jnp.float32)
           + jnp.dot(xc, w1_ref[1], preferred_element_type=jnp.float32)
           + jnp.dot(x_next, w1_ref[2], preferred_element_type=jnp.float32)
           + b1)
    y = _mish(_group_norm(acc.reshape(Bb, T, C), gmat, gmat_t,
                          g1, be1, n_per_group), approx)

    # ---- FiLM (scale/bias were produced by one batched matmul in the wrapper)
    sb = sb_ref[...]                                                # (Bb, 2, C) f32
    y = sb[:, 0:1, :] * y + sb[:, 1:2, :]

    # ---- block 1: Conv1d(Cout->Cout, k=3, p=1), same roll + mask construction.
    y32 = y.reshape(N, C)                                           # f32
    yb = y32.astype(cdtype)
    y_prev = (pltpu.roll(y32, shift=1, axis=0) * not_first).astype(cdtype)
    y_next = (pltpu.roll(y32, shift=N - 1, axis=0) * not_last).astype(cdtype)

    acc2 = (jnp.dot(y_prev, w2_ref[0], preferred_element_type=jnp.float32)
            + jnp.dot(yb, w2_ref[1], preferred_element_type=jnp.float32)
            + jnp.dot(y_next, w2_ref[2], preferred_element_type=jnp.float32)
            + b2)
    y2 = _mish(_group_norm(acc2.reshape(Bb, T, C), gmat, gmat_t,
                           g2, be2, n_per_group), approx)

    # ---- residual: true (Cin, Cout) 1x1 projection, or Identity (no matmul).
    if project_res:
        res = (jnp.dot(xc, wr_ref[...], preferred_element_type=jnp.float32)
               + br).reshape(Bb, T, C)
    else:
        res = x32.reshape(Bb, T, C)                                 # Cin == Cout

    out_ref[...] = (y2 + res).astype(out_ref.dtype)


def _vmem_limit_bytes():
    # Generation-aware VMEM budget: ~56% of per-core VMEM on 64 MiB parts (v7x),
    # 64 MiB on 128 MiB parts (v5e/v6e), conservative if the query fails.
    try:
        cap = int(pltpu.get_tpu_info().vmem_capacity_bytes)
    except Exception:
        return 40 * 1024 * 1024
    return int(min(64 * 1024 * 1024, (cap * 9) // 16))


def _pick_block_batch(B, T, C, vmem_limit):
    # Budget for the main (Bb*T, C) f32 working slabs (several are live at once,
    # plus double-buffered I/O blocks), scaled with the VMEM limit.
    budget = max(1 << 20, vmem_limit // 24)
    rows_cap = max(T, budget // max(1, 4 * C))
    bb_cap = max(1, min(B, rows_cap // T))
    if B >= 2:
        # Keep >= 2 grid steps so dimension_semantics=("parallel",) can shard
        # across both TensorCores on dual-core chips (v7x).
        bb_cap = max(1, min(bb_cap, B // 2))
    # TODO(synk): for B == 1 on dual-TensorCore chips a time-tiled grid axis
    # (with a two-pass GroupNorm) would be needed to use both cores.
    cands = [d for d in range(1, B + 1) if B % d == 0 and d <= bb_cap]
    top = max(cands)
    good = [d for d in cands if 2 * d >= top]
    # Prefer MXU-friendly M = Bb*T (multiples of 256 / 128 / 8 sublanes).
    return max(good, key=lambda d: ((d * T) % 256 == 0, (d * T) % 128 == 0,
                                    (d * T) % 8 == 0, d))


def conditional_residual_block_1d(x, cond, params, n_groups, *, precise=False):
    """x: (B, Cin, T) NCL; cond: (B, cond_dim).  Returns (B, Cout, T)."""
    B, Cin, T = x.shape
    Cout = int(params["b1"].shape[0])
    G = int(n_groups)
    f32 = jnp.float32
    cdtype = f32 if precise else jnp.bfloat16   # MXU operand dtype (accum stays f32)

    project_res = params.get("wr", None) is not None
    if not project_res and Cin != Cout:
        raise ValueError("Identity residual requires in_channels == out_channels")

    vmem_limit = _vmem_limit_bytes()
    Bb = _pick_block_batch(B, T, max(Cin, Cout), vmem_limit)
    grid = (B // Bb,)
    N = Bb * T

    # ---------------- layout glue / hoisted pieces (plain XLA) ----------------
    xt = jnp.transpose(x, (0, 2, 1)).astype(cdtype)                 # (B, T, Cin)

    # FiLM conditioning hoisted: one batched matmul, packed as (B, 2, Cout).
    mish = lambda v: v * jnp.tanh(jax.nn.softplus(v))
    e = mish(cond.astype(f32)) @ params["wc"].astype(f32).T + params["bc"].astype(f32)
    sb = e.reshape(B, 2, Cout)                                      # [:,0]=scale, [:,1]=bias

    # Conv weights as per-tap (Cin, Cout) slabs: w[k][i][o] = torch_w[o, i, k].
    w1 = jnp.transpose(params["w1"], (2, 1, 0)).astype(cdtype)      # (K, Cin, Cout)
    w2 = jnp.transpose(params["w2"], (2, 1, 0)).astype(cdtype)      # (K, Cout, Cout)

    # Per-channel rows packed into one (8, Cout) const block.
    rowv = lambda v: jnp.asarray(v, f32).reshape(1, Cout)
    zero_row = jnp.zeros((1, Cout), f32)
    br_row = rowv(params["br"]) if project_res else zero_row
    rows = jnp.concatenate(
        [rowv(params["b1"]), rowv(params["g1"]), rowv(params["be1"]),
         rowv(params["b2"]), rowv(params["g2"]), rowv(params["be2"]),
         br_row, zero_row], axis=0)                                  # (8, Cout)

    # GroupNorm one-hot group membership (stats via tiny matmuls, f32).
    gmat = (jnp.arange(Cout)[:, None] // (Cout // G)
            == jnp.arange(G)[None, :]).astype(f32)                   # (Cout, G)
    gmat_t = gmat.T                                                   # (G, Cout)

    # Conv zero-padding masks for the rolled +/-1 taps: (Bb*T, 2) f32,
    # column 0 = "not first step in horizon", column 1 = "not last step".
    t_idx = jnp.arange(T)
    edge = jnp.stack([(t_idx != 0), (t_idx != T - 1)], axis=-1).astype(f32)
    edge = jnp.tile(edge, (Bb, 1))                                    # (N, 2)

    args = [xt, sb, w1, w2, rows, gmat, gmat_t, edge]
    if project_res:
        wr = params["wr"][:, :, 0].T.astype(cdtype)                   # (Cin, Cout)
        args.append(wr)

    def batch_spec(shape):
        nd = len(shape)
        return pl.BlockSpec((Bb,) + tuple(shape[1:]),
                            lambda i: (i,) + (0,) * (nd - 1))

    def const_spec(shape):
        nd = len(shape)
        return pl.BlockSpec(tuple(shape), lambda i: (0,) * nd)

    in_specs = [
        batch_spec((B, T, Cin)),
        batch_spec((B, 2, Cout)),
        const_spec((K, Cin, Cout)),
        const_spec((K, Cout, Cout)),
        const_spec((8, Cout)),
        const_spec((Cout, G)),
        const_spec((G, Cout)),
        const_spec((N, 2)),
    ]
    if project_res:
        in_specs.append(const_spec((Cin, Cout)))

    # NOTE: channels-last keeps the lane dim == Cout (lane-dense for production
    # Cout >= 128); tiny Cout pays masked stores but avoids extra transposes.
    out_spec = batch_spec((B, T, Cout))

    wbytes = 2 if cdtype == jnp.bfloat16 else 4
    mxu_flops = 2 * B * T * (K * Cin * Cout + K * Cout * Cout
                             + (Cin * Cout if project_res else 0))
    cost = pl.CostEstimate(
        flops=int(mxu_flops + 20 * B * T * Cout),
        transcendentals=int(4 * B * T * Cout),
        bytes_accessed=int(B * T * Cin * wbytes + B * T * Cout * 4
                           + B * 2 * Cout * 4
                           + (K * Cin * Cout + K * Cout * Cout
                              + (Cin * Cout if project_res else 0)) * wbytes),
    )

    out = pl.pallas_call(
        functools.partial(crb_kernel, approx=not precise, project_res=project_res),
        out_shape=jax.ShapeDtypeStruct((B, T, Cout), x.dtype),
        grid=grid,
        in_specs=in_specs,
        out_specs=out_spec,
        compiler_params=pltpu.CompilerParams(
            dimension_semantics=("parallel",),            # batch blocks independent
            vmem_limit_bytes=int(vmem_limit)),
        cost_estimate=cost,
    )(*args)

    return jnp.transpose(out, (0, 2, 1))                              # (B, Cout, T)


def reference(x, cond, params, n_groups):
    """Pure-JAX reference mirroring the PyTorch module semantics."""
    def mish(v):
        return v * jnp.tanh(jax.nn.softplus(v))

    def conv1d(xx, w, b):
        pad = w.shape[-1] // 2
        y = jax.lax.conv_general_dilated(
            xx, w, (1,), [(pad, pad)], dimension_numbers=("NCH", "OIH", "NCH"))
        return y + b[None, :, None]

    def gn(xx, gamma, beta, G):
        Bc, C, T = xx.shape
        xg = xx.reshape(Bc, G, C // G, T)
        mean = xg.mean(axis=(2, 3), keepdims=True)
        var = ((xg - mean) ** 2).mean(axis=(2, 3), keepdims=True)
        xn = (xg - mean) / jnp.sqrt(var + 1e-5)
        return xn.reshape(Bc, C, T) * gamma[None, :, None] + beta[None, :, None]

    Cout = params["b1"].shape[0]
    out = mish(gn(conv1d(x, params["w1"], params["b1"]),
                  params["g1"], params["be1"], n_groups))
    e = mish(cond) @ params["wc"].T + params["bc"]          # (B, 2*Cout)
    scale = e[:, :Cout][:, :, None]
    bias = e[:, Cout:][:, :, None]
    out = scale * out + bias
    out = mish(gn(conv1d(out, params["w2"], params["b2"]),
                  params["g2"], params["be2"], n_groups))
    if params.get("wr", None) is None:
        res = x
    else:
        res = conv1d(x, params["wr"], params["br"])
    return out + res


if __name__ == "__main__":
    B, Cin, Cout, cond_dim, T, n_groups = 2, 4, 8, 16, 16, 8

    key = jax.random.PRNGKey(0)
    ks = jax.random.split(key, 16)
    f32 = jnp.float32
    params = {
        "w1": 0.2 * jax.random.normal(ks[0], (Cout, Cin, K), f32),
        "b1": 0.2 * jax.random.normal(ks[1], (Cout,), f32),
        "g1": 1.0 + 0.1 * jax.random.normal(ks[2], (Cout,), f32),
        "be1": 0.1 * jax.random.normal(ks[3], (Cout,), f32),
        "wc": 0.2 * jax.random.normal(ks[4], (2 * Cout, cond_dim), f32),
        "bc": 0.2 * jax.random.normal(ks[5], (2 * Cout,), f32),
        "w2": 0.2 * jax.random.normal(ks[6], (Cout, Cout, K), f32),
        "b2": 0.2 * jax.random.normal(ks[7], (Cout,), f32),
        "g2": 1.0 + 0.1 * jax.random.normal(ks[8], (Cout,), f32),
        "be2": 0.1 * jax.random.normal(ks[9], (Cout,), f32),
        "wr": 0.2 * jax.random.normal(ks[10], (Cout, Cin, 1), f32),
        "br": 0.2 * jax.random.normal(ks[11], (Cout,), f32),
    }

    x = jax.random.normal(ks[12], (B, Cin, T), f32)
    cond = jax.random.normal(ks[13], (B, cond_dim), f32)

    ref = reference(x, cond, params, n_groups)

    # Precise path: f32 MXU operands + exact Mish -> matches the module closely.
    out_precise = jax.block_until_ready(
        conditional_residual_block_1d(x, cond, params, n_groups, precise=True))
    np.testing.assert_allclose(np.asarray(out_precise), np.asarray(ref),
                               rtol=1e-3, atol=1e-3)

    # Default fast path: bf16 MXU operands (f32 accumulation) + cheap Mish.
    out_fast = jax.block_until_ready(
        conditional_residual_block_1d(x, cond, params, n_groups))
    np.testing.assert_allclose(np.asarray(out_fast), np.asarray(ref),
                               rtol=5e-2, atol=5e-2)

    # Identity-residual path (in_channels == out_channels -> nn.Identity()).
    params_id = dict(params)
    params_id["w1"] = 0.2 * jax.random.normal(ks[14], (Cout, Cout, K), f32)
    params_id["wr"] = None
    params_id["br"] = None
    x_id = jax.random.normal(ks[15], (B, Cout, T), f32)
    ref_id = reference(x_id, cond, params_id, n_groups)
    out_id = jax.block_until_ready(
        conditional_residual_block_1d(x_id, cond, params_id, n_groups, precise=True))
    np.testing.assert_allclose(np.asarray(out_id), np.asarray(ref_id),
                               rtol=1e-3, atol=1e-3)

    print("KERNEL_OK")
</pallas_src>

<mosaic_0001>
module attributes {stable_mosaic.version = 11 : i64} {
  func.func @crb_kernel(%arg0: i32, %arg1: memref<1x16x4xf32, #tpu.memory_space<vmem>>, %arg2: memref<1x2x8xf32, #tpu.memory_space<vmem>>, %arg3: memref<3x4x8xf32, #tpu.memory_space<vmem>>, %arg4: memref<3x8x8xf32, #tpu.memory_space<vmem>>, %arg5: memref<8x8xf32, #tpu.memory_space<vmem>>, %arg6: memref<8x8xf32, #tpu.memory_space<vmem>>, %arg7: memref<8x8xf32, #tpu.memory_space<vmem>>, %arg8: memref<16x2xf32, #tpu.memory_space<vmem>>, %arg9: memref<4x8xf32, #tpu.memory_space<vmem>>, %arg10: memref<1x16x8xf32, #tpu.memory_space<vmem>>) attributes {dimension_semantics = [#tpu.dimension_semantics<parallel>], iteration_bounds = array<i64: 2>, scalar_prefetch = 0 : i64, scratch_operands = 0 : i64, tpu.core_type = #tpu.core_type<tc>, window_params = [{transform_indices = @transform_0, window_bounds = array<i64: 1, 16, 4>}, {transform_indices = @transform_1, window_bounds = array<i64: 1, 2, 8>}, {pipeline_mode = #tpu.pipeline_mode<synchronous>, transform_indices = @transform_2, window_bounds = array<i64: 3, 4, 8>}, {pipeline_mode = #tpu.pipeline_mode<synchronous>, transform_indices = @transform_3, window_bounds = array<i64: 3, 8, 8>}, {pipeline_mode = #tpu.pipeline_mode<synchronous>, transform_indices = @transform_4, window_bounds = array<i64: 8, 8>}, {pipeline_mode = #tpu.pipeline_mode<synchronous>, transform_indices = @transform_5, window_bounds = array<i64: 8, 8>}, {pipeline_mode = #tpu.pipeline_mode<synchronous>, transform_indices = @transform_6, window_bounds = array<i64: 8, 8>}, {pipeline_mode = #tpu.pipeline_mode<synchronous>, transform_indices = @transform_7, window_bounds = array<i64: 16, 2>}, {pipeline_mode = #tpu.pipeline_mode<synchronous>, transform_indices = @transform_8, window_bounds = array<i64: 4, 8>}, {transform_indices = @transform_9, window_bounds = array<i64: 1, 16, 8>}]} {
    %c0 = arith.constant 0 : index
    %c0_0 = arith.constant 0 : index
    %0 = vector.load %arg6[%c0, %c0_0] : memref<8x8xf32, #tpu.memory_space<vmem>>, vector<8x8xf32>
    %c0_1 = arith.constant 0 : index
    %c0_2 = arith.constant 0 : index
    %1 = vector.load %arg7[%c0_1, %c0_2] : memref<8x8xf32, #tpu.memory_space<vmem>>, vector<8x8xf32>
    %c0_3 = arith.constant 0 : index
    %c0_4 = arith.constant 0 : index
    %2 = vector.load %arg5[%c0_3, %c0_4] : memref<8x8xf32, #tpu.memory_space<vmem>>, vector<8x8xf32>
    %3 = vector.extract_strided_slice %2 {offsets = [0, 0], sizes = [1, 8], strides = [1, 1]} : vector<8x8xf32> to vector<1x8xf32>
    %4 = vector.extract_strided_slice %2 {offsets = [1, 0], sizes = [1, 8], strides = [1, 1]} : vector<8x8xf32> to vector<1x8xf32>
    %5 = vector.extract_strided_slice %2 {offsets = [2, 0], sizes = [1, 8], strides = [1, 1]} : vector<8x8xf32> to vector<1x8xf32>
    %6 = vector.extract_strided_slice %2 {offsets = [3, 0], sizes = [1, 8], strides = [1, 1]} : vector<8x8xf32> to vector<1x8xf32>
    %7 = vector.extract_strided_slice %2 {offsets = [4, 0], sizes = [1, 8], strides = [1, 1]} : vector<8x8xf32> to vector<1x8xf32>
    %8 = vector.extract_strided_slice %2 {offsets = [5, 0], sizes = [1, 8], strides = [1, 1]} : vector<8x8xf32> to vector<1x8xf32>
    %9 = vector.extract_strided_slice %2 {offsets = [6, 0], sizes = [1, 8], strides = [1, 1]} : vector<8x8xf32> to vector<1x8xf32>
    %c0_5 = arith.constant 0 : index
    %c0_6 = arith.constant 0 : index
    %10 = vector.load %arg8[%c0_5, %c0_6] : memref<16x2xf32, #tpu.memory_space<vmem>>, vector<16x2xf32>
    %11 = vector.extract_strided_slice %10 {offsets = [0, 0], sizes = [16, 1], strides = [1, 1]} : vector<16x2xf32> to vector<16x1xf32>
    %12 = vector.extract_strided_slice %10 {offsets = [0, 1], sizes = [16, 1], strides = [1, 1]} : vector<16x2xf32> to vector<16x1xf32>
    %c0_7 = arith.constant 0 : index
    %c0_8 = arith.constant 0 : index
    %c0_9 = arith.constant 0 : index
    %13 = vector.load %arg1[%c0_7, %c0_8, %c0_9] : memref<1x16x4xf32, #tpu.memory_space<vmem>>, vector<1x16x4xf32>
    %14 = vector.shape_cast %13 : vector<1x16x4xf32> to vector<16x4xf32>
    %c1_i32 = arith.constant 1 : i32
    %15 = tpu.dynamic_rotate %14 by %c1_i32 dim 0 : vector<16x4xf32>, i32 -> vector<16x4xf32>
    %16 = vector.broadcast %11 : vector<16x1xf32> to vector<16x4xf32>
    %17 = arith.mulf %15, %16 : vector<16x4xf32>
    %c15_i32 = arith.constant 15 : i32
    %18 = tpu.dynamic_rotate %14 by %c15_i32 dim 0 : vector<16x4xf32>, i32 -> vector<16x4xf32>
    %19 = vector.broadcast %12 : vector<16x1xf32> to vector<16x4xf32>
    %20 = arith.mulf %18, %19 : vector<16x4xf32>
    %c0_10 = arith.constant 0 : index
    %c0_11 = arith.constant 0 : index
    %c0_12 = arith.constant 0 : index
    %21 = vector.load %arg3[%c0_10, %c0_11, %c0_12] : memref<3x4x8xf32, #tpu.memory_space<vmem>>, vector<1x4x8xf32>
    %22 = vector.shape_cast %21 : vector<1x4x8xf32> to vector<4x8xf32>
    %cst = arith.constant dense<0.000000e+00> : vector<16x8xf32>
    %23 = tpu.matmul %17, %22, %cst {dimension_numbers = #tpu.dot_dimension_numbers<[1], [0], [0], [1], [0, 0, 1, 1], [], []>} : vector<16x4xf32>, vector<4x8xf32>, vector<16x8xf32> -> vector<16x8xf32>
    %c1 = arith.constant 1 : index
    %c0_13 = arith.constant 0 : index
    %c0_14 = arith.constant 0 : index
    %24 = vector.load %arg3[%c1, %c0_13, %c0_14] : memref<3x4x8xf32, #tpu.memory_space<vmem>>, vector<1x4x8xf32>
    %25 = vector.shape_cast %24 : vector<1x4x8xf32> to vector<4x8xf32>
    %cst_15 = arith.constant dense<0.000000e+00> : vector<16x8xf32>
    %26 = tpu.matmul %14, %25, %cst_15 {dimension_numbers = #tpu.dot_dimension_numbers<[1], [0], [0], [1], [0, 0, 1, 1], [], []>} : vector<16x4xf32>, vector<4x8xf32>, vector<16x8xf32> -> vector<16x8xf32>
    %27 = arith.addf %23, %26 : vector<16x8xf32>
    %c2 = arith.constant 2 : index
    %c0_16 = arith.constant 0 : index
    %c0_17 = arith.constant 0 : index
    %28 = vector.load %arg3[%c2, %c0_16, %c0_17] : memref<3x4x8xf32, #tpu.memory_space<vmem>>, vector<1x4x8xf32>
    %29 = vector.shape_cast %28 : vector<1x4x8xf32> to vector<4x8xf32>
    %cst_18 = arith.constant dense<0.000000e+00> : vector<16x8xf32>
    %30 = tpu.matmul %20, %29, %cst_18 {dimension_numbers = #tpu.dot_dimension_numbers<[1], [0], [0], [1], [0, 0, 1, 1], [], []>} : vector<16x4xf32>, vector<4x8xf32>, vector<16x8xf32> -> vector<16x8xf32>
    %31 = arith.addf %27, %30 : vector<16x8xf32>
    %32 = vector.broadcast %3 : vector<1x8xf32> to vector<16x8xf32>
    %33 = arith.addf %31, %32 : vector<16x8xf32>
    %34 = vector.shape_cast %33 : vector<16x8xf32> to vector<1x16x8xf32>
    %cst_19 = arith.constant dense<0.000000e+00> : vector<1x8xf32>
    %35 = vector.multi_reduction <add>, %34, %cst_19 [1] : vector<1x16x8xf32> to vector<1x8xf32>
    %36 = arith.mulf %34, %34 : vector<1x16x8xf32>
    %cst_20 = arith.constant dense<0.000000e+00> : vector<1x8xf32>
    %37 = vector.multi_reduction <add>, %36, %cst_20 [1] : vector<1x16x8xf32> to vector<1x8xf32>
    %cst_21 = arith.constant dense<0.000000e+00> : vector<1x8xf32>
    %38 = tpu.matmul %35, %0, %cst_21 {dimension_numbers = #tpu.dot_dimension_numbers<[1], [0], [0], [1], [0, 0, 1, 1], [], []>} : vector<1x8xf32>, vector<8x8xf32>, vector<1x8xf32> -> vector<1x8xf32>
    %cst_22 = arith.constant dense<0.000000e+00> : vector<1x8xf32>
    %39 = tpu.matmul %37, %0, %cst_22 {dimension_numbers = #tpu.dot_dimension_numbers<[1], [0], [0], [1], [0, 0, 1, 1], [], []>} : vector<1x8xf32>, vector<8x8xf32>, vector<1x8xf32> -> vector<1x8xf32>
    %cst_23 = arith.constant 1.600000e+01 : f32
    %40 = vector.broadcast %cst_23 : f32 to vector<1x8xf32>
    %41 = arith.divf %38, %40 : vector<1x8xf32>
    %cst_24 = arith.constant 1.600000e+01 : f32
    %42 = vector.broadcast %cst_24 : f32 to vector<1x8xf32>
    %43 = arith.divf %39, %42 : vector<1x8xf32>
    %44 = arith.mulf %41, %41 : vector<1x8xf32>
    %45 = arith.subf %43, %44 : vector<1x8xf32>
    %cst_25 = arith.constant 0.000000e+00 : f32
    %46 = vector.broadcast %cst_25 : f32 to vector<1x8xf32>
    %47 = arith.maximumf %45, %46 : vector<1x8xf32>
    %cst_26 = arith.constant dense<0.000000e+00> : vector<1x8xf32>
    %48 = tpu.matmul %41, %1, %cst_26 {dimension_numbers = #tpu.dot_dimension_numbers<[1], [0], [0], [1], [0, 0, 1, 1], [], []>} : vector<1x8xf32>, vector<8x8xf32>, vector<1x8xf32> -> vector<1x8xf32>
    %49 = vector.shape_cast %48 : vector<1x8xf32> to vector<1x1x8xf32>
    %cst_27 = arith.constant dense<0.000000e+00> : vector<1x8xf32>
    %50 = tpu.matmul %47, %1, %cst_27 {dimension_numbers = #tpu.dot_dimension_numbers<[1], [0], [0], [1], [0, 0, 1, 1], [], []>} : vector<1x8xf32>, vector<8x8xf32>, vector<1x8xf32> -> vector<1x8xf32>
    %51 = vector.shape_cast %50 : vector<1x8xf32> to vector<1x1x8xf32>
    %52 = vector.broadcast %49 : vector<1x1x8xf32> to vector<1x16x8xf32>
    %53 = arith.subf %34, %52 : vector<1x16x8xf32>
    %cst_28 = arith.constant 9.99999974E-6 : f32
    %54 = vector.broadcast %cst_28 : f32 to vector<1x1x8xf32>
    %55 = arith.addf %51, %54 : vector<1x1x8xf32>
    %56 = math.rsqrt %55 : vector<1x1x8xf32>
    %57 = vector.broadcast %56 : vector<1x1x8xf32> to vector<1x16x8xf32>
    %58 = arith.mulf %53, %57 : vector<1x16x8xf32>
    %59 = vector.shape_cast %4 : vector<1x8xf32> to vector<1x1x8xf32>
    %60 = vector.broadcast %59 : vector<1x1x8xf32> to vector<1x16x8xf32>
    %61 = arith.mulf %58, %60 : vector<1x16x8xf32>
    %62 = vector.shape_cast %5 : vector<1x8xf32> to vector<1x1x8xf32>
    %63 = vector.broadcast %62 : vector<1x1x8xf32> to vector<1x16x8xf32>
    %64 = arith.addf %61, %63 : vector<1x16x8xf32>
    %cst_29 = arith.constant 0.000000e+00 : f32
    %65 = vector.broadcast %cst_29 : f32 to vector<1x16x8xf32>
    %66 = arith.maximumf %64, %65 : vector<1x16x8xf32>
    %67 = vector.broadcast %cst_29 : f32 to vector<1x16x8xf32>
    %68 = arith.subf %64, %67 : vector<1x16x8xf32>
    %69 = arith.cmpf one, %68, %68 : vector<1x16x8xf32>
    %70 = vector.broadcast %cst_29 : f32 to vector<1x16x8xf32>
    %71 = arith.addf %64, %70 : vector<1x16x8xf32>
    %72 = math.absf %68 : vector<1x16x8xf32>
    %cst_30 = arith.constant 0.000000e+00 : f32
    %73 = vector.broadcast %cst_30 : f32 to vector<1x16x8xf32>
    %74 = arith.subf %73, %72 : vector<1x16x8xf32>
    %75 = math.exp %74 : vector<1x16x8xf32>
    %76 = math.log1p %75 : vector<1x16x8xf32>
    %77 = arith.addf %66, %76 : vector<1x16x8xf32>
    %78 = arith.select %69, %71, %77 : vector<1x16x8xi1>, vector<1x16x8xf32>
    %79 = math.tanh %78 : vector<1x16x8xf32>
    %80 = arith.mulf %64, %79 : vector<1x16x8xf32>
    %c0_31 = arith.constant 0 : index
    %c0_32 = arith.constant 0 : index
    %c0_33 = arith.constant 0 : index
    %81 = vector.load %arg2[%c0_31, %c0_32, %c0_33] : memref<1x2x8xf32, #tpu.memory_space<vmem>>, vector<1x2x8xf32>
    %82 = vector.extract_strided_slice %81 {offsets = [0, 0, 0], sizes = [1, 1, 8], strides = [1, 1, 1]} : vector<1x2x8xf32> to vector<1x1x8xf32>
    %83 = vector.broadcast %82 : vector<1x1x8xf32> to vector<1x16x8xf32>
    %84 = arith.mulf %83, %80 : vector<1x16x8xf32>
    %85 = vector.extract_strided_slice %81 {offsets = [0, 1, 0], sizes = [1, 1, 8], strides = [1, 1, 1]} : vector<1x2x8xf32> to vector<1x1x8xf32>
    %86 = vector.broadcast %85 : vector<1x1x8xf32> to vector<1x16x8xf32>
    %87 = arith.addf %84, %86 : vector<1x16x8xf32>
    %88 = vector.shape_cast %87 : vector<1x16x8xf32> to vector<16x8xf32>
    %c1_i32_34 = arith.constant 1 : i32
    %89 = tpu.dynamic_rotate %88 by %c1_i32_34 dim 0 : vector<16x8xf32>, i32 -> vector<16x8xf32>
    %90 = vector.broadcast %11 : vector<16x1xf32> to vector<16x8xf32>
    %91 = arith.mulf %89, %90 : vector<16x8xf32>
    %c15_i32_35 = arith.constant 15 : i32
    %92 = tpu.dynamic_rotate %88 by %c15_i32_35 dim 0 : vector<16x8xf32>, i32 -> vector<16x8xf32>
    %93 = vector.broadcast %12 : vector<16x1xf32> to vector<16x8xf32>
    %94 = arith.mulf %92, %93 : vector<16x8xf32>
    %c0_36 = arith.constant 0 : index
    %c0_37 = arith.constant 0 : index
    %c0_38 = arith.constant 0 : index
    %95 = vector.load %arg4[%c0_36, %c0_37, %c0_38] : memref<3x8x8xf32, #tpu.memory_space<vmem>>, vector<1x8x8xf32>
    %96 = vector.shape_cast %95 : vector<1x8x8xf32> to vector<8x8xf32>
    %cst_39 = arith.constant dense<0.000000e+00> : vector<16x8xf32>
    %97 = tpu.matmul %91, %96, %cst_39 {dimension_numbers = #tpu.dot_dimension_numbers<[1], [0], [0], [1], [0, 0, 1, 1], [], []>} : vector<16x8xf32>, vector<8x8xf32>, vector<16x8xf32> -> vector<16x8xf32>
    %c1_40 = arith.constant 1 : index
    %c0_41 = arith.constant 0 : index
    %c0_42 = arith.constant 0 : index
    %98 = vector.load %arg4[%c1_40, %c0_41, %c0_42] : memref<3x8x8xf32, #tpu.memory_space<vmem>>, vector<1x8x8xf32>
    %99 = vector.shape_cast %98 : vector<1x8x8xf32> to vector<8x8xf32>
    %cst_43 = arith.constant dense<0.000000e+00> : vector<16x8xf32>
    %100 = tpu.matmul %88, %99, %cst_43 {dimension_numbers = #tpu.dot_dimension_numbers<[1], [0], [0], [1], [0, 0, 1, 1], [], []>} : vector<16x8xf32>, vector<8x8xf32>, vector<16x8xf32> -> vector<16x8xf32>
    %101 = arith.addf %97, %100 : vector<16x8xf32>
    %c2_44 = arith.constant 2 : index
    %c0_45 = arith.constant 0 : index
    %c0_46 = arith.constant 0 : index
    %102 = vector.load %arg4[%c2_44, %c0_45, %c0_46] : memref<3x8x8xf32, #tpu.memory_space<vmem>>, vector<1x8x8xf32>
    %103 = vector.shape_cast %102 : vector<1x8x8xf32> to vector<8x8xf32>
    %cst_47 = arith.constant dense<0.000000e+00> : vector<16x8xf32>
    %104 = tpu.matmul %94, %103, %cst_47 {dimension_numbers = #tpu.dot_dimension_numbers<[1], [0], [0], [1], [0, 0, 1, 1], [], []>} : vector<16x8xf32>, vector<8x8xf32>, vector<16x8xf32> -> vector<16x8xf32>
    %105 = arith.addf %101, %104 : vector<16x8xf32>
    %106 = vector.broadcast %6 : vector<1x8xf32> to vector<16x8xf32>
    %107 = arith.addf %105, %106 : vector<16x8xf32>
    %108 = vector.shape_cast %107 : vector<16x8xf32> to vector<1x16x8xf32>
    %cst_48 = arith.constant dense<0.000000e+00> : vector<1x8xf32>
    %109 = vector.multi_reduction <add>, %108, %cst_48 [1] : vector<1x16x8xf32> to vector<1x8xf32>
    %110 = arith.mulf %108, %108 : vector<1x16x8xf32>
    %cst_49 = arith.constant dense<0.000000e+00> : vector<1x8xf32>
    %111 = vector.multi_reduction <add>, %110, %cst_49 [1] : vector<1x16x8xf32> to vector<1x8xf32>
    %cst_50 = arith.constant dense<0.000000e+00> : vector<1x8xf32>
    %112 = tpu.matmul %109, %0, %cst_50 {dimension_numbers = #tpu.dot_dimension_numbers<[1], [0], [0], [1], [0, 0, 1, 1], [], []>} : vector<1x8xf32>, vector<8x8xf32>, vector<1x8xf32> -> vector<1x8xf32>
    %cst_51 = arith.constant dense<0.000000e+00> : vector<1x8xf32>
    %113 = tpu.matmul %111, %0, %cst_51 {dimension_numbers = #tpu.dot_dimension_numbers<[1], [0], [0], [1], [0, 0, 1, 1], [], []>} : vector<1x8xf32>, vector<8x8xf32>, vector<1x8xf32> -> vector<1x8xf32>
    %cst_52 = arith.constant 1.600000e+01 : f32
    %114 = vector.broadcast %cst_52 : f32 to vector<1x8xf32>
    %115 = arith.divf %112, %114 : vector<1x8xf32>
    %cst_53 = arith.constant 1.600000e+01 : f32
    %116 = vector.broadcast %cst_53 : f32 to vector<1x8xf32>
    %117 = arith.divf %113, %116 : vector<1x8xf32>
    %118 = arith.mulf %115, %115 : vector<1x8xf32>
    %119 = arith.subf %117, %118 : vector<1x8xf32>
    %cst_54 = arith.constant 0.000000e+00 : f32
    %120 = vector.broadcast %cst_54 : f32 to vector<1x8xf32>
    %121 = arith.maximumf %119, %120 : vector<1x8xf32>
    %cst_55 = arith.constant dense<0.000000e+00> : vector<1x8xf32>
    %122 = tpu.matmul %115, %1, %cst_55 {dimension_numbers = #tpu.dot_dimension_numbers<[1], [0], [0], [1], [0, 0, 1, 1], [], []>} : vector<1x8xf32>, vector<8x8xf32>, vector<1x8xf32> -> vector<1x8xf32>
    %123 = vector.shape_cast %122 : vector<1x8xf32> to vector<1x1x8xf32>
    %cst_56 = arith.constant dense<0.000000e+00> : vector<1x8xf32>
    %124 = tpu.matmul %121, %1, %cst_56 {dimension_numbers = #tpu.dot_dimension_numbers<[1], [0], [0], [1], [0, 0, 1, 1], [], []>} : vector<1x8xf32>, vector<8x8xf32>, vector<1x8xf32> -> vector<1x8xf32>
    %125 = vector.shape_cast %124 : vector<1x8xf32> to vector<1x1x8xf32>
    %126 = vector.broadcast %123 : vector<1x1x8xf32> to vector<1x16x8xf32>
    %127 = arith.subf %108, %126 : vector<1x16x8xf32>
    %cst_57 = arith.constant 9.99999974E-6 : f32
    %128 = vector.broadcast %cst_57 : f32 to vector<1x1x8xf32>
    %129 = arith.addf %125, %128 : vector<1x1x8xf32>
    %130 = math.rsqrt %129 : vector<1x1x8xf32>
    %131 = vector.broadcast %130 : vector<1x1x8xf32> to vector<1x16x8xf32>
    %132 = arith.mulf %127, %131 : vector<1x16x8xf32>
    %133 = vector.shape_cast %7 : vector<1x8xf32> to vector<1x1x8xf32>
    %134 = vector.broadcast %133 : vector<1x1x8xf32> to vector<1x16x8xf32>
    %135 = arith.mulf %132, %134 : vector<1x16x8xf32>
    %136 = vector.shape_cast %8 : vector<1x8xf32> to vector<1x1x8xf32>
    %137 = vector.broadcast %136 : vector<1x1x8xf32> to vector<1x16x8xf32>
    %138 = arith.addf %135, %137 : vector<1x16x8xf32>
    %cst_58 = arith.constant 0.000000e+00 : f32
    %139 = vector.broadcast %cst_58 : f32 to vector<1x16x8xf32>
    %140 = arith.maximumf %138, %139 : vector<1x16x8xf32>
    %141 = vector.broadcast %cst_58 : f32 to vector<1x16x8xf32>
    %142 = arith.subf %138, %141 : vector<1x16x8xf32>
    %143 = arith.cmpf one, %142, %142 : vector<1x16x8xf32>
    %144 = vector.broadcast %cst_58 : f32 to vector<1x16x8xf32>
    %145 = arith.addf %138, %144 : vector<1x16x8xf32>
    %146 = math.absf %142 : vector<1x16x8xf32>
    %cst_59 = arith.constant 0.000000e+00 : f32
    %147 = vector.broadcast %cst_59 : f32 to vector<1x16x8xf32>
    %148 = arith.subf %147, %146 : vector<1x16x8xf32>
    %149 = math.exp %148 : vector<1x16x8xf32>
    %150 = math.log1p %149 : vector<1x16x8xf32>
    %151 = arith.addf %140, %150 : vector<1x16x8xf32>
    %152 = arith.select %143, %145, %151 : vector<1x16x8xi1>, vector<1x16x8xf32>
    %153 = math.tanh %152 : vector<1x16x8xf32>
    %154 = arith.mulf %138, %153 : vector<1x16x8xf32>
    %c0_60 = arith.constant 0 : index
    %c0_61 = arith.constant 0 : index
    %155 = vector.load %arg9[%c0_60, %c0_61] : memref<4x8xf32, #tpu.memory_space<vmem>>, vector<4x8xf32>
    %cst_62 = arith.constant dense<0.000000e+00> : vector<16x8xf32>
    %156 = tpu.matmul %14, %155, %cst_62 {dimension_numbers = #tpu.dot_dimension_numbers<[1], [0], [0], [1], [0, 0, 1, 1], [], []>} : vector<16x4xf32>, vector<4x8xf32>, vector<16x8xf32> -> vector<16x8xf32>
    %157 = vector.broadcast %9 : vector<1x8xf32> to vector<16x8xf32>
    %158 = arith.addf %156, %157 : vector<16x8xf32>
    %159 = vector.shape_cast %158 : vector<16x8xf32> to vector<1x16x8xf32>
    %160 = arith.addf %154, %159 : vector<1x16x8xf32>
    %c0_63 = arith.constant 0 : index
    %c0_64 = arith.constant 0 : index
    %c0_65 = arith.constant 0 : index
    %161 = vector.load %arg10[%c0_63, %c0_64, %c0_65] : memref<1x16x8xf32, #tpu.memory_space<vmem>>, vector<1x16x8xf32>
    tpu.vector_store %arg10[%c0_63, %c0_64, %c0_65], %160 {strides = array<i32>} : memref<1x16x8xf32, #tpu.memory_space<vmem>>, vector<1x16x8xf32>,
    return
  }
  func.func @transform_0(%arg0: i32) -> (i32, i32, i32) {
    %c0_i32 = arith.constant 0 : i32
    %c0_i32_0 = arith.constant 0 : i32
    %c0_i32_1 = arith.constant 0 : i32
    return %arg0, %c0_i32, %c0_i32_0 : i32, i32, i32
  }
  func.func @transform_1(%arg0: i32) -> (i32, i32, i32) {
    %c0_i32 = arith.constant 0 : i32
    %c0_i32_0 = arith.constant 0 : i32
    %c0_i32_1 = arith.constant 0 : i32
    return %arg0, %c0_i32, %c0_i32_0 : i32, i32, i32
  }
  func.func @transform_2(%arg0: i32) -> (i32, i32, i32) {
    %c0_i32 = arith.constant 0 : i32
    %c0_i32_0 = arith.constant 0 : i32
    %c0_i32_1 = arith.constant 0 : i32
    %c0_i32_2 = arith.constant 0 : i32
    return %c0_i32, %c0_i32_0, %c0_i32_1 : i32, i32, i32
  }
  func.func @transform_3(%arg0: i32) -> (i32, i32, i32) {
    %c0_i32 = arith.constant 0 : i32
    %c0_i32_0 = arith.constant 0 : i32
    %c0_i32_1 = arith.constant 0 : i32
    %c0_i32_2 = arith.constant 0 : i32
    return %c0_i32, %c0_i32_0, %c0_i32_1 : i32, i32, i32
  }
  func.func @transform_4(%arg0: i32) -> (i32, i32) {
    %c0_i32 = arith.constant 0 : i32
    %c0_i32_0 = arith.constant 0 : i32
    %c0_i32_1 = arith.constant 0 : i32
    return %c0_i32, %c0_i32_0 : i32, i32
  }
  func.func @transform_5(%arg0: i32) -> (i32, i32) {
    %c0_i32 = arith.constant 0 : i32
    %c0_i32_0 = arith.constant 0 : i32
    %c0_i32_1 = arith.constant 0 : i32
    return %c0_i32, %c0_i32_0 : i32, i32
  }
  func.func @transform_6(%arg0: i32) -> (i32, i32) {
    %c0_i32 = arith.constant 0 : i32
    %c0_i32_0 = arith.constant 0 : i32
    %c0_i32_1 = arith.constant 0 : i32
    return %c0_i32, %c0_i32_0 : i32, i32
  }
  func.func @transform_7(%arg0: i32) -> (i32, i32) {
    %c0_i32 = arith.constant 0 : i32
    %c0_i32_0 = arith.constant 0 : i32
    %c0_i32_1 = arith.constant 0 : i32
    return %c0_i32, %c0_i32_0 : i32, i32
  }
  func.func @transform_8(%arg0: i32) -> (i32, i32) {
    %c0_i32 = arith.constant 0 : i32
    %c0_i32_0 = arith.constant 0 : i32
    %c0_i32_1 = arith.constant 0 : i32
    return %c0_i32, %c0_i32_0 : i32, i32
  }
  func.func @transform_9(%arg0: i32) -> (i32, i32, i32) {
    %c0_i32 = arith.constant 0 : i32
    %c0_i32_0 = arith.constant 0 : i32
    %c0_i32_1 = arith.constant 0 : i32
    return %arg0, %c0_i32, %c0_i32_0 : i32, i32, i32
  }
}

</mosaic_0001>

<bundles_post_ra>
// kernel: tpu_custom_call.1
= control target key start
LH: loop header
LB: loop body
LE: loop exit
PB: predicated region body
PF: predicated region fallthrough
CT: control target
= control target key end

     0   :  { %14 = vsyncpa [#allocation3], 0  ;;  %s2587_s0 = inlined_call_operand.vmem [shape: f32[2,16,4], index: 0, kind: input, shape index: {}]   ;;  %s2588_s1 = inlined_call_operand.hbm [shape: f32[2,2,8], index: 1, kind: input, shape index: {}]   ;;  %s2589_s2 = inlined_call_operand.vmem [shape: f32[3,4,8], index: 2, kind: input, shape index: {}]   ;;  %s2590_s3 = inlined_call_operand.vmem [shape: f32[3,8,8], index: 3, kind: input, shape index: {}]   ;;  %s2591_s4 = inlined_call_operand.vmem [shape: f32[8,8], index: 4, kind: input, shape index: {}]   ;;  %s2592_s5 = inlined_call_operand.vmem [shape: f32[8,8], index: 5, kind: input, shape index: {}]   ;;  %s2593_s6 = inlined_call_operand.vmem [shape: f32[8,8], index: 6, kind: input, shape index: {}]   ;;  %s2594_s7 = inlined_call_operand.vmem [shape: f32[16,2], index: 7, kind: input, shape index: {}]   ;;  %s2595_s8 = inlined_call_operand.vmem [shape: f32[4,8], index: 8, kind: input, shape index: {}]   ;;  %s2596_s9 = inlined_call_operand.vmem [shape: f32[2,16,8], index: 9, kind: output, shape index: {}]  }
   0x1   :  { %16 = vsyncpa [#allocation3 + $0x1], 0  ;;  %s2253_s30 = smov 0   ;;  %s2255_s10 = smov 0  }
   0x2   :  { %s2257_s11 = smov 0   ;;  %s2259_s12 = smov 0  }
   0x3 LB: > { %s2272_s13 = sadd.s32 4294967295, %s2196_s12   ;;  %s2275_s14 = sadd.s32 1, %s2196_s12   ;;  %s2196_s12 = sphi %s2259_s12, %s2604_s12   ;;  %s2192_s11 = sphi %s2257_s11, %s2603_s11   ;;  %s2188_s10 = sphi %s2255_s10, %s2602_s10   ;;  %s2184_s30 = sphi %s2253_s30, %s2601_s30  }
   0x4   : > { %s52_s15 = ssub.s32 %s2196_s12, %s2275_s14  ;;  %s55_s16 = sadd.s32 1, %s2192_s11 }
   0x5   : > { %p53_p0 = scmp.eq.s32.totalorder %s52_s15, 0  ;;  %p62_p1 = scmp.ne.s32.totalorder %s2192_s11, %s2188_s10 }
   0x6   : > { %p63_p2 = scmp.eq.s32.totalorder %s2196_s12, 0  ;;  %p68_p3 = scmp.ne.s32.totalorder %s2188_s10, %s2184_s30 }
   0x7   : > { %s2285_s17 = scalar_select %p53_p0, %s2192_s11, %s55_s16  }
   0x8   : > { %p64_p4 = por %p63_p2, %p62_p1  ;;  %p69_p5 = scmp.eq.s32.totalorder %s2272_s13, 0 }
   0x9   : > { %p2064_p6 = scmp.lt.s32.totalorder %s2196_s12, 2  ;;  %s294_s19 = sand.u32 1, %s2192_s11  }
   0xa   : > { %p2289_p7 = por %p69_p5, %p68_p3  ;;  %s1896_s20 = sshll.u32 %s294_s19, 1 }
   0xb   : > { %s1897_s21 = sshll.u32 %s2196_s12, 5  ;;  %s298_s25 = scalar_lea.vmem [#allocation2], %s1896_s20 }
   0xc   : > { %s2298_s24 = scalar_lea.hbm %s2588_s1, %s1897_s21  ;;  %s305_s26 = sshll.u32 %s298_s25, 4  ;;  %s2300_s26 = int_to_ptr.vmem [resolvable:$true] %s305_s26 }
   0xd   : > { %p2302_p8 = pnand %p2064_p6, %p64_p4  ;;  %s295_s28 = scalar_lea.sflag [#allocation3], %s294_s19 }
   0xe   : > { %s2132_s29 = scalar_lea.hbm %s2298_s24, 32  ;;  %s2137_s16 = scalar_lea.hbm %s2588_s1, 64 }
   0xf   : > { %p2133_p11 = scmp.ne.s32.totalorder %s2298_s24, %s2132_s29  ;;  %p2134_p12 = pneg %p2302_p8 }
  0x10   : > { %p2138_p1 = scmp.lt.u32.totalorder %s2298_s24, %s2588_s1  ;;  %p2139_p2 = scmp.lt.u32.totalorder %s2137_s16, %s2132_s29 }
  0x11   : > { %p2135_p13 = pnand %p2134_p12, %p2133_p11  ;;  %p2141_p4 = scmp.lt.u32.totalorder %s2132_s29, %s2298_s24 }
  0x12   : > { %p2140_p3 = por %p2139_p2, %p2138_p1 }
  0x13   : > { %p2136_p0 = pneg %p2135_p13 }
  0x14   : > { %p2142_p5 = por %p2141_p4, %p2140_p3 }
  0x16   : > { %p2143_p6 = pnand %p2142_p5, %p2136_p0 }
  0x18   : > { %2146 = shalt.err (!%p2143_p6)
}
  0x19   : > { %s2147_s19 = scalar_lea.vmem %s2300_s26, 32  ;;  %s2198_s22 = smov [#allocation2]  }
  0x1a   : > { %p2148_p11 = scmp.ne.s32.totalorder %s2300_s26, %s2147_s19  ;;  %s2152_s23 = sshll.u32 %s2198_s22, 4  ;;  %s2153_s23 = int_to_ptr.vmem [resolvable:$false] %s2152_s23 }
  0x1b   : > { %s2154_s25 = scalar_lea.vmem %s2153_s23, 64  ;;  %p2155_p10 = scmp.lt.s32.totalorder %s2300_s26, %s2153_s23 }
  0x1c   : > { %p2150_p13 = pnand %p2148_p11, %p2134_p12  ;;  %p2156_p1 = scmp.lt.s32.totalorder %s2154_s25, %s2147_s19 }
  0x1e   : > { %p2151_p9 = pneg %p2150_p13  ;;  %p2157_p2 = por %p2156_p1, %p2155_p10 }
  0x20   : > { %p2158_p3 = pnand %p2157_p2, %p2151_p9 }
  0x22   : > { %2161 = shalt.err (!%p2158_p3)
}
  0x23   : > { %2063 = dma.hbm_to_vmem [thread:$0]  (!%p2302_p8), %s2298_s24, 32, %s2300_s26, %s295_s28  }
  0x24   : > { %p2599_p0 = scmp.lt.s32.totalorder %s2196_s12, 3  ;;  %p2600_p4 = scmp.ge.s32.totalorder %s2196_s12, 1 }
  0x26   : > { %p311_p12 = pnand %p2600_p4, %p2599_p0 }
  0x27   : > { %s316_s29 = sand.u32 (!%p311_p12), 1, %s2188_s10  }
  0x28   : > { %314 = sbr.rel (%p311_p12) target bundleno = 1685 (0x695), region = 56  ;;  %s2338_s30 = sshll.u32 (!%p311_p12), %s316_s29, 1 }
  0x29   : > { %s317_s15 = scalar_lea.sflag (!%p311_p12), [#allocation3], %s316_s29  ;;  %s320_s16 = scalar_lea.vmem (!%p311_p12), [#allocation2], %s2338_s30 }
  0x2f   : > { %2179 = dma.done.wait (%p2289_p7), %s317_s15, 32  }
  0x30   : > { %2181 = vsyncadd (%p2289_p7), %s317_s15, 4294967264  ;;  %p360_p8 = scmp.lt.s32.totalorder %s2272_s13, 1  ;;  %v2199_v0 = vmov 0   ;;  %v2200_v1 = vmov 1   ;;  %vm421_vm0 = vcmask 1043456   ;;  %vm414_vm1 = vcmask 31744  }
  0x31   : > { %2101 = vset.pattern.permute.xlu0 %v2199_v0  ;;  %2102 = vset.pattern.permute.xlu1 %v2200_v1  ;;  %v373_v2 = vld [vmem:[%s2594_s7] sm:$0xff]  ;;  %v374_v7 = vld [vmem:[%s2594_s7 + $0x8] sm:$0xff]  ;;  %v379_v9 = vlaneseq  ;;  %v2201_v28 = vmov 0.0   ;;  %vm2202_vm4 = vmmov 0   ;;  %vm678_vm5 = vcmask 64512  }
  0x32   : > { %s2606_s13 = smov (!%p360_p8, %s2272_s13), 1  ;;  %v1904_v3 = vld [vmem:[%s2589_s2 + $0x4] sm:$0xf]  ;;  %386 = vperm.xlu0 %2101, %v373_v2   ;;  %402 = vperm.xlu1 %2102, %v373_v2   ;;  %v411_v5 = vld [vmem:[%s2589_s2] sm:$0xf]  ;;  %v1919_v2 = vld [vmem:[%s2590_s3 + $0x8] sm:$0xff] }
  0x33   : > { %s1936_s12 = sshll.u32 %s2606_s13, 4  ;;  %1975 = vmatprep.subr.msk.mxu0 %vm421_vm0, %v1904_v3  ;;  %v1911_v8 = vld [vmem:[%s2589_s2 + $0x8] sm:$0xf]  ;;  %v2383_v10 = vshrl.u32 %v379_v9, 7  ;;  %v2419_v27 = vld [vmem:[%s2592_s5] sm:$0xff]  ;;  %1990 = vmatprep.subr.mxu1 %v2201_v28 }
  0x34   : > { %s364_s27 = scalar_lea.vmem %s2587_s0, %s1936_s12  ;;  %1976 = vmatpush3.msk.msra.mxu0 %vm421_vm0, %v1904_v3  ;;  %1992 = vmatprep.mubr.msk.f32.mxu1 %vm2202_vm4, %v2201_v28  ;;  %v2435_v30 = vld [vmem:[%s2591_s4] sm:$0xff]  ;;  %s369_s26 = scalar_lea.vmem %s2596_s9, %s1936_s12 }
  0x35   : > { %v2361_v4 = vld [vmem:[%s364_s27] sm:$0xff]  ;;  %v2366_v6 = vld [vmem:[%s364_s27 + $0x8] sm:$0xff]  ;;  %1980 = vmatprep.subr.msk.mxu0 %vm421_vm0, %v411_v5  ;;  %vm381_vm2 = vcmp.lt.s32.totalorder %v2383_v10, 1  ;;  %vm398_vm3 = vcmp.lt.s32.totalorder %v2383_v10, 7  ;;  %1991 = vmatpush3.msra.mxu1 %v2419_v27  ;;  %v2430_v29 = vsub.s32 0, %v2383_v10 }
  0x36   : > { %1977 = vmatprep.mubr.msk.f32.mxu0 %vm414_vm1, %v2361_v4  ;;  %391 = vperm.xlu0 %2101, %v374_v7   ;;  %v377_v11 = vrot.slane %v2361_v4, 7  ;;  %v378_v12 = vrot.slane %v2366_v6, 7  ;;  %v396_v13 = vrot.slane %v2361_v4, 1  ;;  %v397_v14 = vrot.slane %v2366_v6, 1  ;;  %v2464_v56 = vld [vmem:[%s2593_s6] sm:$0xff] }
  0x37   : > { %1978 = vmatmul.mubr.msk.f32.vlgmr.msra.gmra.mrb[0].mxu0 %vm414_vm1, %v2366_v6  ;;  %406 = vperm.xlu1 %2102, %v374_v7   ;;  %v675_v31 = vrot.slane %v2435_v30, %v2430_v29  ;;  %v2481_v3 = vld [vmem:[%s2590_s3] sm:$0xff] }
  0x38   : > { %1981 = vmatpush3.msk.msra.mxu0 %vm421_vm0, %v411_v5  ;;  %v383_v15 = vsel %vm381_vm2, %v378_v12, %v377_v11  ;;  %v399_v18 = vsel %vm398_vm3, %v396_v13, %v397_v14  ;;  %v382_v19 = vsel %vm381_vm2, %v377_v11, %v378_v12  ;;  %v400_v24 = vsel %vm398_vm3, %v397_v14, %v396_v13 }
  0x39   : > { %1985 = vmatprep.subr.msk.mxu0 %vm421_vm0, %v1911_v8  ;;  %1995 = vmatprep.subr.mxu1 %v2201_v28  ;;  %v1013_v13 = vsub.s32 1, %v2383_v10  ;;  %v1019_v14 = vsub.s32 2, %v2383_v10 }
  0x3a   : > { %2103 = vset.pattern.permute.xlu0 %v2200_v1 }
  0xb1   : > { %v2393_v16 = vpop.permute.xlu0 %386  ;;  %v2401_v20 = vpop.permute.xlu1 %402 }
  0xb2   : > { %v394_v17 = vmul.f32 %v2393_v16, %v383_v15  ;;  %v409_v21 = vmul.f32 %v2401_v20, %v399_v18 }
  0xb4   : > { %1982 = vmatprep.mubr.msk.f32.mxu0 %vm414_vm1, %v394_v17 }
  0xb5   : > { %v2404_v22 = vpop.permute.xlu0 %391 }
  0xb6   : > { %v395_v23 = vmul.f32 %v2404_v22, %v382_v19  ;;  %v2412_v25 = vpop.permute.xlu1 %406 }
  0xb7   : > { %v410_v26 = vmul.f32 %v2412_v25, %v400_v24 }
  0xb8   : > { %1983 = vmatmul.mubr.msk.f32.vlgmr.msra.gmra.mrb[0].mxu0 %vm414_vm1, %v395_v23 }
  0xb9   : > { %1986 = vmatpush3.msk.msra.mxu0 %vm421_vm0, %v1911_v8  ;;  %1987 = vmatprep.mubr.msk.f32.mxu0 %vm414_vm1, %v409_v21  ;;  %v1014_v21 = vrot.slane %v2435_v30, %v1013_v13 }
  0xba   : > { %2005 = vmatprep.subr.mxu0 %v2201_v28 }
  0xc0   : > { %1988 = vmatmul.mubr.msk.f32.vlgmr.msra.gmra.mrb[0].mxu0 %vm414_vm1, %v410_v26  ;;  %v1020_v26 = vrot.slane %v2435_v30, %v1019_v14 }
  0xc1   : > { %2007 = vmatprep.mubr.msk.f32.mxu0 %vm2202_vm4, %v2201_v28  ;;  %2006 = vmatpush3.msra.mxu0 %v2464_v56 }
  0xc2   : > { %2025 = vmatprep.subr.mxu0 %v2201_v28 }
 0x193   : > { %v1989_v32 = vpop.f32.mrb[0].mxu0 }
 0x194   : > { %v2439_v33 = vadd.f32 %v1989_v32, %v675_v31  ;;  %v661_v34 = vpop.f32.mrb[1].mxu0 }
 0x195   : > { %v2441_v35 = vadd.f32 %v675_v31, %v661_v34 }
 0x196   : > { %v680_v36 = vsel %vm678_vm5, %v2439_v33, 0.0  ;;  %v689_v37 = vmul.f32 %v2439_v33, %v2439_v33 }
 0x197   : > { %v679_v38 = vsel %vm678_vm5, %v2441_v35, 0.0  ;;  %v688_v39 = vmul.f32 %v2441_v35, %v2441_v35 }
 0x198   : > { %v691_v40 = vsel %vm678_vm5, %v689_v37, 0.0  ;;  %v681_v41 = vadd.f32 %v680_v36, %v679_v38 }
 0x199   : > { %v690_v42 = vsel %vm678_vm5, %v688_v39, 0.0 }
 0x19a   : > { %v682_v43 = vrot.slane %v681_v41, 4  ;;  %v692_v44 = vadd.f32 %v691_v40, %v690_v42 }
 0x19c   : > { %v683_v45 = vadd.f32 %v682_v43, %v681_v41  ;;  %v693_v46 = vrot.slane %v692_v44, 4 }
 0x19e   : > { %v684_v47 = vrot.slane %v683_v45, 2  ;;  %v694_v48 = vadd.f32 %v693_v46, %v692_v44 }
 0x1a0   : > { %v695_v49 = vrot.slane %v694_v48, 2  ;;  %v685_v50 = vadd.f32 %v684_v47, %v683_v45 }
 0x1a2   : > { %v696_v51 = vadd.f32 %v695_v49, %v694_v48  ;;  %v686_v52 = vrot.slane %v685_v50, 1 }
 0x1a4   : > { %v687_v53 = vadd.f32 %v686_v52, %v685_v50  ;;  %v697_v54 = vrot.slane %v696_v51, 1 }
 0x1a6   : > { %1993 = vmatmul.mubr.msk.f32.vlgmr.msra.gmra.mrb[0].mxu1 %vm678_vm5, %v687_v53  ;;  %v698_v55 = vadd.f32 %v697_v54, %v696_v51 }
 0x1a7   : > { %1996 = vmatpush3.msra.mxu1 %v2419_v27  ;;  %1997 = vmatprep.mubr.msk.f32.mxu1 %vm2202_vm4, %v2201_v28 }
 0x1a8   : > { %2000 = vmatprep.subr.mxu1 %v2201_v28 }
 0x1aa   : > { %1998 = vmatmul.mubr.msk.f32.vlgmr.msra.gmra.mrb[2].mxu1 %vm678_vm5, %v698_v55 }
 0x1ab   : > { %2002 = vmatprep.mubr.msk.f32.mxu1 %vm2202_vm4, %v2201_v28  ;;  %2001 = vmatpush3.msra.mxu1 %v2464_v56 }
 0x1ac   : > { %2010 = vmatprep.subr.mxu1 %v1919_v2 }
 0x279   : > { %v768_v57 = vpop.f32.mrb[0].mxu1 }
 0x27a   : > { %v846_v58 = vmul.f32 0.0625, %v768_v57  ;;  %v1994_v59 = vpop.f32.mrb[1].mxu1 }
 0x27c   : > { %2003 = vmatmul.mubr.msk.f32.vlgmr.msra.gmra.mrb[4].mxu1 %vm678_vm5, %v846_v58  ;;  %v848_v61 = vmul.f32 %v846_v58, %v846_v58 }
 0x27d   : > { %v841_v60 = vpop.f32.mrb[2].mxu1  ;;  %2011 = vmatpush3.msra.mxu1 %v1919_v2  ;;  %v1063_v2 = vld [vmem:[%s320_s16] sm:$0x3] }
 0x27e   : > { %v847_v62 = vmul.f32 0.0625, %v841_v60  ;;  %v1999_v63 = vpop.f32.mrb[3].mxu1  ;;  %2015 = vmatprep.subr.mxu1 %v2481_v3 }
 0x280   : > { %v849_v0 = vsub.f32 %v847_v62, %v848_v61 }
 0x282   : > { %v850_v1 = vmax.f32 %v849_v0, 0.0 }
 0x284   : > { %2008 = vmatmul.mubr.msk.f32.vlgmr.msra.gmra.mrb[2].mxu0 %vm678_vm5, %v850_v1 }
 0x285   : > { %2026 = vmatpush3.msra.mxu0 %v2419_v27  ;;  %2027 = vmatprep.mubr.msk.f32.mxu0 %vm2202_vm4, %v2201_v28 }
 0x286   : > { %2030 = vmatprep.subr.mxu0 %v2201_v28 }
 0x34f   : > { %v920_v5 = vpop.f32.mrb[4].mxu1 }
 0x350   : > { %v2004_v7 = vpop.f32.mrb[5].mxu1  ;;  %v1000_v12 = vrot.slane %v920_v5, %v2430_v29  ;;  %v1067_v5 = vrot.slane %v1063_v2, %v2430_v29 }
 0x352   : > { %v1001_v17 = vsub.f32 %v2441_v35, %v1000_v12  ;;  %v1002_v18 = vsub.f32 %v2439_v33, %v1000_v12 }
 0x357   : > { %v993_v8 = vpop.f32.mrb[2].mxu0 }
 0x358   : > { %v1003_v9 = vadd.f32 1e-05, %v993_v8  ;;  %v2009_v11 = vpop.f32.mrb[3].mxu0 }
 0x359   : > { %v1073_v11 = vrot.slane %v1063_v2, %v1013_v13 }
 0x35a   : > { %2104 = vrsqrt.f32 %v1003_v9 }
 0x364   : > { %v2105_v15 = vpop.eup %2104 }
 0x365   : > { %v1008_v19 = vrot.slane %v2105_v15, %v2430_v29 }
 0x367   : > { %v1009_v23 = vmul.f32 %v1008_v19, %v1001_v17  ;;  %v1010_v24 = vmul.f32 %v1008_v19, %v1002_v18 }
 0x369   : > { %v1015_v31 = vmul.f32 %v1014_v21, %v1009_v23  ;;  %v1016_v32 = vmul.f32 %v1014_v21, %v1010_v24  ;;  %v1924_v23 = vld [vmem:[%s2590_s3 + $0x10] sm:$0xff] }
 0x36b   : > { %v1021_v34 = vadd.f32 %v1020_v26, %v1015_v31  ;;  %v1022_v36 = vadd.f32 %v1020_v26, %v1016_v32 }
 0x36d   : > { %v1029_v37 = vand.u32 2147483647, %v1021_v34  ;;  %v1030_v38 = vand.u32 2147483647, %v1022_v36  ;;  %v1023_v55 = vmax.f32 %v1021_v34, 0.0  ;;  %v1024_v59 = vmax.f32 %v1022_v36, 0.0 }
 0x36e   : > { %vm1025_vm8 = vcmp.ne.f32.partialorder %v1021_v34, %v1021_v34  ;;  %vm1026_vm9 = vcmp.ne.f32.partialorder %v1022_v36, %v1022_v36 }
 0x36f   : > { %v1031_v39 = vsub.f32 0.0, %v1029_v37  ;;  %v1032_v40 = vsub.f32 0.0, %v1030_v38 }
 0x371   : > { %v1033_v41 = vmul.f32 1.442695, %v1031_v39  ;;  %v1035_v35 = vmul.f32 1.442695, %v1032_v40 }
 0x373   : > { %2106 = vpow2.f32 %v1033_v41 }
 0x374   : > { %2108 = vpow2.f32 %v1035_v35 }
 0x37d   : > { %v2107_v33 = vpop.eup %2106 }
 0x37e   : > { %v2109_v42 = vpop.eup %2108  ;;  %v1037_v43 = vadd.f32 1.0, %v2107_v33  ;;  %v1040_v45 = vmul.f32 -0.5, %v2107_v33  ;;  %v1043_v48 = vand.u32 2147483647, %v2107_v33 }
 0x37f   : > { %v1046_v44 = vadd.f32 1.0, %v2109_v42  ;;  %v1049_v46 = vmul.f32 -0.5, %v2109_v42  ;;  %v1052_v50 = vand.u32 2147483647, %v2109_v42 }
 0x380   : > { %2110 = vlog2.f32 %v1037_v43  ;;  %v1041_v47 = vadd.f32 1.0, %v1040_v45  ;;  %vm1044_vm6 = vcmp.lt.f32.partialorder %v1043_v48, 0.0004427343 }
 0x381   : > { %2112 = vlog2.f32 %v1046_v44  ;;  %v1050_v49 = vadd.f32 1.0, %v1049_v46  ;;  %vm1053_vm7 = vcmp.lt.f32.partialorder %v1052_v50, 0.0004427343 }
 0x382   : > { %v1042_v54 = vmul.f32 %v2107_v33, %v1041_v47 }
 0x383   : > { %v1051_v58 = vmul.f32 %v2109_v42, %v1050_v49 }
 0x38a   : > { %v2111_v51 = vpop.eup %2110 }
 0x38b   : > { %v2113_v52 = vpop.eup %2112  ;;  %v1039_v53 = vmul.f32 0.6931472, %v2111_v51 }
 0x38c   : > { %v1048_v57 = vmul.f32 0.6931472, %v2113_v52 }
 0x38d   : > { %v1045_v60 = vsel %vm1044_vm6, %v1042_v54, %v1039_v53 }
 0x38e   : > { %v1054_v61 = vsel %vm1053_vm7, %v1051_v58, %v1048_v57  ;;  %v1055_v62 = vadd.f32 %v1045_v60, %v1023_v55  ;;  %v1727_v60 = vld [vmem:[%s2595_s8] sm:$0xf] }
 0x38f   : > { %v1056_v63 = vadd.f32 %v1054_v61, %v1024_v59 }
 0x390   : > { %v1057_v0 = vsel %vm1025_vm8, %v1021_v34, %v1055_v62 }
 0x391   : > { %v1058_v1 = vsel %vm1026_vm9, %v1022_v36, %v1056_v63  ;;  %2114 = vtanh.f32 %v1057_v0 }
 0x392   : > { %2116 = vtanh.f32 %v1058_v1 }
 0x39b   : > { %v2115_v7 = vpop.eup %2114 }
 0x39c   : > { %v2117_v8 = vpop.eup %2116  ;;  %v1061_v9 = vmul.f32 %v2115_v7, %v1021_v34 }
 0x39d   : > { %v1062_v12 = vmul.f32 %v2117_v8, %v1022_v36 }
 0x39e   : > { %v1068_v14 = vmul.f32 %v1067_v5, %v1061_v9 }
 0x39f   : > { %v1069_v15 = vmul.f32 %v1067_v5, %v1062_v12 }
 0x3a0   : > { %v1074_v17 = vadd.f32 %v1073_v11, %v1068_v14 }
 0x3a1   : > { %v1075_v18 = vadd.f32 %v1073_v11, %v1069_v15  ;;  %v1677_v15 = vsub.s32 4, %v2383_v10 }
 0x3a2   : > { %v1076_v19 = vrot.slane %v1074_v17, 7  ;;  %v1082_v21 = vrot.slane %v1074_v17, 1  ;;  %2012 = vmatprep.mubr.msk.f32.mxu1 %vm678_vm5, %v1074_v17  ;;  %v1683_v17 = vsub.s32 5, %v2383_v10 }
 0x3a3   : > { %2013 = vmatmul.mubr.msk.f32.vlgmr.msra.gmra.mrb[6].mxu1 %vm678_vm5, %v1075_v18  ;;  %v1077_v24 = vrot.slane %v1075_v18, 7  ;;  %v1083_v26 = vrot.slane %v1075_v18, 1 }
 0x3a4   : > { %2016 = vmatpush3.msra.mxu1 %v2481_v3 }
 0x3a5   : > { %v1079_v13 = vsel %vm381_vm2, %v1077_v24, %v1076_v19  ;;  %2020 = vmatprep.subr.mxu1 %v1924_v23  ;;  %v1078_v31 = vsel %vm381_vm2, %v1076_v19, %v1077_v24  ;;  %v1084_v32 = vsel %vm398_vm3, %v1082_v21, %v1083_v26  ;;  %v1085_v34 = vsel %vm398_vm3, %v1083_v26, %v1082_v21 }
 0x3a6   : > { %v1080_v36 = vmul.f32 %v1079_v13, %v2393_v16  ;;  %v1081_v37 = vmul.f32 %v1078_v31, %v2404_v22  ;;  %v1086_v3 = vmul.f32 %v1084_v32, %v2401_v20  ;;  %v1087_v38 = vmul.f32 %v1085_v34, %v2412_v25 }
 0x3a7   : > { %v1340_v16 = vsub.s32 3, %v2383_v10  ;;  %v1684_v13 = vrot.slane %v2435_v30, %v1683_v17 }
 0x3a8   : > { %2017 = vmatprep.mubr.msk.f32.mxu1 %vm678_vm5, %v1080_v36 }
 0x3a9   : > { %v1341_v20 = vrot.slane %v2435_v30, %v1340_v16 }
 0x3ab   : > { %2018 = vmatmul.mubr.msk.f32.vlgmr.msra.gmra.mrb[6].mxu1 %vm678_vm5, %v1081_v37 }
 0x3ac   : > { %2021 = vmatpush3.msra.mxu1 %v1924_v23  ;;  %2022 = vmatprep.mubr.msk.f32.mxu1 %vm678_vm5, %v1086_v3  ;;  %v1678_v23 = vrot.slane %v2435_v30, %v1677_v15 }
 0x3ad   : > { %2040 = vmatprep.subr.mxu1 %v2201_v28 }
 0x3b3   : > { %2023 = vmatmul.mubr.msk.f32.vlgmr.msra.gmra.mrb[6].mxu1 %vm678_vm5, %v1087_v38 }
 0x3b4   : > { %2041 = vmatpush3.msra.mxu1 %v2464_v56  ;;  %2042 = vmatprep.mubr.msk.f32.mxu1 %vm2202_vm4, %v2201_v28 }
 0x486   : > { %v2024_v22 = vpop.f32.mrb[6].mxu1 }
 0x487   : > { %v2523_v39 = vadd.f32 %v2024_v22, %v1341_v20  ;;  %v1327_v40 = vpop.f32.mrb[7].mxu1 }
 0x488   : > { %v1342_v41 = vadd.f32 %v1341_v20, %v1327_v40 }
 0x489   : > { %v1345_v35 = vsel %vm678_vm5, %v2523_v39, 0.0  ;;  %v1354_v25 = vmul.f32 %v2523_v39, %v2523_v39 }
 0x48a   : > { %v1344_v33 = vsel %vm678_vm5, %v1342_v41, 0.0  ;;  %v1353_v42 = vmul.f32 %v1342_v41, %v1342_v41 }
 0x48b   : > { %v1356_v43 = vsel %vm678_vm5, %v1354_v25, 0.0  ;;  %v1346_v44 = vadd.f32 %v1345_v35, %v1344_v33 }
 0x48c   : > { %v1355_v45 = vsel %vm678_vm5, %v1353_v42, 0.0 }
 0x48d   : > { %v1347_v46 = vrot.slane %v1346_v44, 4  ;;  %v1357_v47 = vadd.f32 %v1356_v43, %v1355_v45 }
 0x48f   : > { %v1348_v48 = vadd.f32 %v1347_v46, %v1346_v44  ;;  %v1358_v49 = vrot.slane %v1357_v47, 4 }
 0x491   : > { %v1349_v50 = vrot.slane %v1348_v48, 2  ;;  %v1359_v51 = vadd.f32 %v1358_v49, %v1357_v47 }
 0x493   : > { %v1350_v52 = vadd.f32 %v1349_v50, %v1348_v48  ;;  %v1360_v53 = vrot.slane %v1359_v51, 2 }
 0x495   : > { %v1351_v54 = vrot.slane %v1350_v52, 1  ;;  %v1361_v55 = vadd.f32 %v1360_v53, %v1359_v51 }
 0x497   : > { %v1352_v57 = vadd.f32 %v1351_v54, %v1350_v52  ;;  %v1362_v58 = vrot.slane %v1361_v55, 1 }
 0x499   : > { %2028 = vmatmul.mubr.msk.f32.vlgmr.msra.gmra.mrb[4].mxu0 %vm678_vm5, %v1352_v57  ;;  %v1363_v59 = vadd.f32 %v1362_v58, %v1361_v55 }
 0x49a   : > { %2031 = vmatpush3.msra.mxu0 %v2419_v27  ;;  %2032 = vmatprep.mubr.msk.f32.mxu0 %vm2202_vm4, %v2201_v28 }
 0x49b   : > { %2035 = vmatprep.subr.mxu0 %v2201_v28 }
 0x49d   : > { %2033 = vmatmul.mubr.msk.f32.vlgmr.msra.gmra.mrb[6].mxu0 %vm678_vm5, %v1363_v59 }
 0x49e   : > { %2036 = vmatpush3.msra.mxu0 %v2464_v56  ;;  %2037 = vmatprep.mubr.msk.f32.mxu0 %vm2202_vm4, %v2201_v28 }
 0x49f   : > { %2045 = vmatprep.subr.msk.mxu0 %vm421_vm0, %v1727_v60 }
 0x56c   : > { %v1433_v27 = vpop.f32.mrb[4].mxu0 }
 0x56d   : > { %v1510_v61 = vmul.f32 0.0625, %v1433_v27  ;;  %v2029_v62 = vpop.f32.mrb[5].mxu0 }
 0x56f   : > { %2038 = vmatmul.mubr.msk.f32.vlgmr.msra.gmra.mrb[8].mxu0 %vm678_vm5, %v1510_v61  ;;  %v1512_v56 = vmul.f32 %v1510_v61, %v1510_v61 }
 0x570   : > { %v1506_v63 = vpop.f32.mrb[6].mxu0  ;;  %2046 = vmatpush3.msk.msra.mxu0 %vm421_vm0, %v1727_v60  ;;  %2047 = vmatprep.mubr.msk.f32.mxu0 %vm414_vm1, %v2361_v4  ;;  %v1730_v60 = vsub.s32 6, %v2383_v10 }
 0x571   : > { %v1511_v0 = vmul.f32 0.0625, %v1506_v63  ;;  %v2034_v28 = vpop.f32.mrb[7].mxu0 }
 0x572   : > { %v1731_v27 = vrot.slane %v2435_v30, %v1730_v60 }
 0x573   : > { %v1513_v1 = vsub.f32 %v1511_v0, %v1512_v56  ;;  %2048 = vmatmul.mubr.msk.f32.vlgmr.msra.gmra.mrb[10].mxu0 %vm414_vm1, %v2366_v6 }
 0x575   : > { %v1514_v2 = vmax.f32 %v1513_v1, 0.0 }
 0x577   : > { %2043 = vmatmul.mubr.msk.f32.vlgmr.msra.gmra.mrb[8].mxu1 %vm678_vm5, %v1514_v2 }
 0x642   : > { %v1584_v5 = vpop.f32.mrb[8].mxu0 }
 0x643   : > { %v2039_v7 = vpop.f32.mrb[9].mxu0  ;;  %v1664_v4 = vrot.slane %v1584_v5, %v2430_v29 }
 0x645   : > { %v1665_v18 = vsub.f32 %v1342_v41, %v1664_v4  ;;  %v1666_v19 = vsub.f32 %v2523_v39, %v1664_v4 }
 0x646   : > { %v2552_v8 = vpop.f32.mrb[10].mxu0 }
 0x647   : > { %v2554_v9 = vpop.f32.mrb[11].mxu0  ;;  %v1807_v61 = vadd.f32 %v2552_v8, %v1731_v27 }
 0x648   : > { %v1802_v63 = vadd.f32 %v2554_v9, %v1731_v27 }
 0x64a   : > { %v1657_v11 = vpop.f32.mrb[8].mxu1 }
 0x64b   : > { %v1667_v12 = vadd.f32 1e-05, %v1657_v11  ;;  %v2044_v14 = vpop.f32.mrb[9].mxu1 }
 0x64d   : > { %2118 = vrsqrt.f32 %v1667_v12 }
 0x657   : > { %v2119_v6 = vpop.eup %2118 }
 0x658   : > { %v1672_v21 = vrot.slane %v2119_v6, %v2430_v29 }
 0x65a   : > { %v1673_v24 = vmul.f32 %v1672_v21, %v1665_v18  ;;  %v1674_v26 = vmul.f32 %v1672_v21, %v1666_v19 }
 0x65c   : > { %v1679_v31 = vmul.f32 %v1678_v23, %v1673_v24  ;;  %v1680_v32 = vmul.f32 %v1678_v23, %v1674_v26 }
 0x65e   : > { %v1686_v34 = vadd.f32 %v1684_v13, %v1680_v32  ;;  %v1685_v36 = vadd.f32 %v1684_v13, %v1679_v31 }
 0x660   : > { %v1694_v37 = vand.u32 2147483647, %v1686_v34  ;;  %v1693_v3 = vand.u32 2147483647, %v1685_v36  ;;  %v1688_v49 = vmax.f32 %v1686_v34, 0.0  ;;  %v1687_v53 = vmax.f32 %v1685_v36, 0.0 }
 0x661   : > { %vm1690_vm12 = vcmp.ne.f32.partialorder %v1686_v34, %v1686_v34  ;;  %vm1689_vm13 = vcmp.ne.f32.partialorder %v1685_v36, %v1685_v36 }
 0x662   : > { %v1696_v38 = vsub.f32 0.0, %v1694_v37  ;;  %v1695_v16 = vsub.f32 0.0, %v1693_v3 }
 0x664   : > { %v1699_v20 = vmul.f32 1.442695, %v1696_v38  ;;  %v1697_v22 = vmul.f32 1.442695, %v1695_v16 }
 0x666   : > { %2120 = vpow2.f32 %v1699_v20 }
 0x667   : > { %2122 = vpow2.f32 %v1697_v22 }
 0x670   : > { %v2121_v39 = vpop.eup %2120 }
 0x671   : > { %v2123_v29 = vpop.eup %2122  ;;  %v1710_v40 = vadd.f32 1.0, %v2121_v39  ;;  %v1713_v35 = vmul.f32 -0.5, %v2121_v39  ;;  %v1716_v42 = vand.u32 2147483647, %v2121_v39 }
 0x672   : > { %v1701_v41 = vadd.f32 1.0, %v2123_v29  ;;  %v1704_v25 = vmul.f32 -0.5, %v2123_v29  ;;  %v1707_v44 = vand.u32 2147483647, %v2123_v29 }
 0x673   : > { %2124 = vlog2.f32 %v1710_v40  ;;  %v1714_v33 = vadd.f32 1.0, %v1713_v35  ;;  %vm1717_vm10 = vcmp.lt.f32.partialorder %v1716_v42, 0.0004427343 }
 0x674   : > { %2126 = vlog2.f32 %v1701_v41  ;;  %v1705_v43 = vadd.f32 1.0, %v1704_v25  ;;  %vm1708_vm11 = vcmp.lt.f32.partialorder %v1707_v44, 0.0004427343 }
 0x675   : > { %v1715_v48 = vmul.f32 %v2121_v39, %v1714_v33 }
 0x676   : > { %v1706_v51 = vmul.f32 %v2123_v29, %v1705_v43 }
 0x67d   : > { %v2125_v45 = vpop.eup %2124 }
 0x67e   : > { %v2127_v46 = vpop.eup %2126  ;;  %v1712_v47 = vmul.f32 0.6931472, %v2125_v45 }
 0x67f   : > { %v1703_v50 = vmul.f32 0.6931472, %v2127_v46 }
 0x680   : > { %v1718_v52 = vsel %vm1717_vm10, %v1715_v48, %v1712_v47 }
 0x681   : > { %v1720_v54 = vadd.f32 %v1718_v52, %v1688_v49  ;;  %v1709_v55 = vsel %vm1708_vm11, %v1706_v51, %v1703_v50 }
 0x682   : > { %v1719_v57 = vadd.f32 %v1709_v55, %v1687_v53 }
 0x683   : > { %v1722_v58 = vsel %vm1690_vm12, %v1686_v34, %v1720_v54 }
 0x684   : > { %2128 = vtanh.f32 %v1722_v58  ;;  %v1721_v59 = vsel %vm1689_vm13, %v1685_v36, %v1719_v57 }
 0x685   : > { %2130 = vtanh.f32 %v1721_v59 }
 0x68e   : > { %v2129_v62 = vpop.eup %2128 }
 0x68f   : > { %v2131_v56 = vpop.eup %2130  ;;  %v1726_v0 = vmul.f32 %v2129_v62, %v1686_v34 }
 0x690   : > { %v1725_v28 = vmul.f32 %v2131_v56, %v1685_v36 }
 0x691   : > { %v1811_v1 = vadd.f32 %v1807_v61, %v1726_v0 }
 0x692   : > { %v1810_v2 = vadd.f32 %v1802_v63, %v1725_v28 }
 0x693   : > { %1813 = vst.msk [vmem:[%s369_s26 + $0x8] sm:$0xff] %vm678_vm5, %v1811_v1 }
 0x694   : > { %1812 = vst.msk [vmem:[%s369_s26] sm:$0xff] %vm678_vm5, %v1810_v2 }
 0x695 PF: > { %p19_p7 = scmp.ge.s32.totalorder %s2275_s14, 4   ;;  %s2601_s30 = smov %s2188_s10 }
 0x696   : > { %s2602_s10 = smov %s2192_s11  ;;  %s2603_s11 = smov %s2285_s17 }
 0x697   : > { %s2604_s12 = smov %s2275_s14  ;;  %21 = sbr.rel (!%p19_p7) target bundleno = 3 (0x3), region = 103 }
 0x69e   :  { %1835 = vsyncpa [#allocation3], 1 }
 0x69f   :  { %1837 = vsyncpa [#allocation3 + $0x1], 1 }

</bundles_post_ra>
